<compile_context>
chip_gen: v7x
topology: tpu7x:2x2x1
jax: 0.10.0
libtpu: 0.0.40
codegen_flags: <defaults>
</compile_context>

<pallas_src>
import functools

import jax
import jax.numpy as jnp
from jax.experimental import pallas as pl
from jax.experimental.pallas import tpu as pltpu

LAMBDA_COORD = 5.0
LAMBDA_NOOBJ = 0.5

_ROW_TILE = 256  # rows-of-128 per grid step (multiple of 8); ~0.9 MiB/input tile


def _yolo_loss_kernel(x_ref, y_ref, coord_ref, objsq_ref, ce_ref, mask_ref):
    # x_ref, y_ref: [7, Rt, 128] f32 (channel-plane layout, rows on lane axis).
    # Outputs: lane-dense [Rt, 128] planes.
    xc0, xc1 = x_ref[0], x_ref[1]          # class logits
    xo = x_ref[2]                          # objectness
    xx, xy = x_ref[3], x_ref[4]            # center xy
    xw, xh = x_ref[5], x_ref[6]            # wh

    yc0, yc1 = y_ref[0], y_ref[1]
    yo = y_ref[2]
    yx, yy = y_ref[3], y_ref[4]
    yw, yh = y_ref[5], y_ref[6]

    mask = (yo == 1.0).astype(jnp.float32)

    # xy regression (whole-vreg VPU ops, no cross-lane reductions)
    dx = xx - yx
    dy = xy - yy
    xy_loss = dx * dx + dy * dy

    # wh regression: (sqrt(a)-sqrt(b))^2 == a + b - 2*sqrt(a*b)
    wh_loss = (xw + yw - 2.0 * jnp.sqrt(xw * yw)) + \
              (xh + yh - 2.0 * jnp.sqrt(xh * yh))

    coord_ref[...] = LAMBDA_COORD * (xy_loss + wh_loss)

    # objectness squared error (global obj/noobj sums are done outside)
    do = xo - yo
    objsq_ref[...] = do * do

    # 2-class cross entropy with soft targets:
    # logsumexp(l0, l1) = max(l0, l1) + log(1 + exp(-|l0 - l1|))
    d = jnp.abs(xc0 - xc1)
    lse = jnp.maximum(xc0, xc1) + jnp.log(1.0 + jnp.exp(-d))
    ce = yc0 * (lse - xc0) + yc1 * (lse - xc1)
    ce_ref[...] = mask * ce
    mask_ref[...] = mask


@jax.jit
def _yolo_loss_dense(x, y):
    """Jittable portion: Pallas kernel + tiny scalar reductions.

    Returns (dense_total_per_row [M], obj_mask [M] bool)."""
    B, A, G, C = x.shape            # [B, 3, 4, 7]
    M = B * A * G
    x2 = x.reshape(M, C).astype(jnp.float32)
    y2 = y.reshape(M, C).astype(jnp.float32)

    # Row padding so rows form a [R_pad, 128] lane-dense slab, R_pad % 8 == 0.
    R = pl.cdiv(M, 128)
    if R <= _ROW_TILE:
        Rt = max(8, ((R + 7) // 8) * 8)
        R_pad = Rt
    else:
        Rt = _ROW_TILE
        R_pad = ((R + Rt - 1) // Rt) * Rt
    M_pad = R_pad * 128
    pad = M_pad - M

    x_p = jnp.pad(x2, ((0, pad), (0, 0)))   # zero padding contributes 0 loss
    y_p = jnp.pad(y2, ((0, pad), (0, 0)))
    # Channel-plane layout: [7, R_pad, 128]; row m -> (m // 128, m % 128).
    x_cp = x_p.T.reshape(C, R_pad, 128)
    y_cp = y_p.T.reshape(C, R_pad, 128)

    plane = jax.ShapeDtypeStruct((R_pad, 128), jnp.float32)
    coord, objsq, ce_m, mask = pl.pallas_call(
        _yolo_loss_kernel,
        out_shape=(plane, plane, plane, plane),
        grid_spec=pltpu.PrefetchScalarGridSpec(
            num_scalar_prefetch=0,
            grid=(R_pad // Rt,),
            in_specs=[
                pl.BlockSpec((C, Rt, 128), lambda r: (0, r, 0)),
                pl.BlockSpec((C, Rt, 128), lambda r: (0, r, 0)),
            ],
            out_specs=[
                pl.BlockSpec((Rt, 128), lambda r: (r, 0)),
                pl.BlockSpec((Rt, 128), lambda r: (r, 0)),
                pl.BlockSpec((Rt, 128), lambda r: (r, 0)),
                pl.BlockSpec((Rt, 128), lambda r: (r, 0)),
            ],
        ),
        compiler_params=pltpu.CompilerParams(
            dimension_semantics=("parallel",)),  # rows split across TCs on v7x
    )(x_cp, y_cp)

    # Global scalar reductions hoisted out of the per-row kernel path.
    obj_loss = jnp.sum(mask * objsq)
    noobj_loss = jnp.sum((1.0 - mask) * objsq)       # padded rows contribute 0
    n_obj = jnp.sum(mask)
    cls_loss = jnp.sum(ce_m) / n_obj                 # nan if n_obj == 0 (== torch)

    dense = (coord.reshape(M_pad)[:M]
             + obj_loss + LAMBDA_NOOBJ * noobj_loss + cls_loss)
    obj_mask = mask.reshape(M_pad)[:M] > 0.5
    return dense, obj_mask


def yolo_loss_pallas(x, y):
    """x, y: [B, 3, 4, 7].  Returns the loss vector of shape [N] where
    N = number of elements with y[..., 2] == 1 (same as the PyTorch module)."""
    dense, obj_mask = _yolo_loss_dense(x, y)
    # TODO(synk): the dynamic-length boolean gather x[obj_mask] has no
    # fixed-shape equivalent; it is done eagerly on the concrete mask here,
    # outside the jitted Pallas portion.
    return dense[obj_mask]


def yolo_loss_ref(x, y, lambda_coord=LAMBDA_COORD, lambda_noobj=LAMBDA_NOOBJ):
    """Pure-JAX reference mirroring the PyTorch forward."""
    obj_mask = (y[..., 2] == 1.0)
    pred = x[obj_mask]
    tgt = y[obj_mask]
    xy_loss = jnp.sum((pred[:, 3:5] - tgt[:, 3:5]) ** 2, axis=1)
    wh_loss = jnp.sum((jnp.sqrt(pred[:, 5:7]) - jnp.sqrt(tgt[:, 5:7])) ** 2, axis=1)
    obj_loss = jnp.sum((pred[:, 2] - tgt[:, 2]) ** 2)
    logp = jax.nn.log_softmax(pred[:, 0:2], axis=1)
    cls_loss = jnp.mean(-jnp.sum(tgt[:, 0:2] * logp, axis=1))
    noobj_pred = x[~obj_mask]
    noobj_tgt = y[~obj_mask]
    noobj_loss = jnp.sum((noobj_pred[:, 2] - noobj_tgt[:, 2]) ** 2)
    return lambda_coord * (xy_loss + wh_loss) + obj_loss + lambda_noobj * noobj_loss + cls_loss


if __name__ == "__main__":
    key = jax.random.PRNGKey(0)
    k1, k2, k3, k4 = jax.random.split(key, 4)

    B = 2
    shape = (B, 3, 4, 7)

    # Predictions: class logits (ch 0:2) arbitrary; objectness (ch 2) arbitrary;
    # xy (ch 3:5) arbitrary; wh (ch 5:7) strictly positive (sqrt is applied).
    x = jax.random.uniform(k1, shape, jnp.float32, minval=0.1, maxval=1.0)

    # Targets: deterministic obj mask, class probabilities, xy in [0,1], positive wh.
    y = jax.random.uniform(k2, shape, jnp.float32, minval=0.1, maxval=1.0)
    cls_probs = jax.nn.softmax(jax.random.normal(k3, (B, 3, 4, 2)), axis=-1)
    obj = (jnp.arange(B * 3 * 4) % 3 == 0).astype(jnp.float32).reshape(B, 3, 4)
    y = y.at[..., 0:2].set(cls_probs)
    y = y.at[..., 2].set(obj)

    out = yolo_loss_pallas(x, y)
    out = jax.block_until_ready(out)

    ref = yolo_loss_ref(x, y)
    assert out.shape == ref.shape, (out.shape, ref.shape)
    assert jnp.allclose(out, ref, rtol=1e-5, atol=1e-5), (out, ref)

    print("KERNEL_OK")
</pallas_src>

<mosaic_0001>
module attributes {stable_mosaic.version = 11 : i64} {
  func.func @_yolo_loss_kernel(%arg0: i32, %arg1: memref<7x8x128xf32, #tpu.memory_space<vmem>>, %arg2: memref<7x8x128xf32, #tpu.memory_space<vmem>>, %arg3: memref<8x128xf32, #tpu.memory_space<vmem>>, %arg4: memref<8x128xf32, #tpu.memory_space<vmem>>, %arg5: memref<8x128xf32, #tpu.memory_space<vmem>>, %arg6: memref<8x128xf32, #tpu.memory_space<vmem>>) attributes {dimension_semantics = [#tpu.dimension_semantics<parallel>], iteration_bounds = array<i64: 1>, scalar_prefetch = 0 : i64, scratch_operands = 0 : i64, tpu.core_type = #tpu.core_type<tc>, window_params = [{transform_indices = @transform_0, window_bounds = array<i64: 7, 8, 128>}, {transform_indices = @transform_1, window_bounds = array<i64: 7, 8, 128>}, {transform_indices = @transform_2, window_bounds = array<i64: 8, 128>}, {transform_indices = @transform_3, window_bounds = array<i64: 8, 128>}, {transform_indices = @transform_4, window_bounds = array<i64: 8, 128>}, {transform_indices = @transform_5, window_bounds = array<i64: 8, 128>}]} {
    %c0 = arith.constant 0 : index
    %c0_0 = arith.constant 0 : index
    %c0_1 = arith.constant 0 : index
    %0 = vector.load %arg1[%c0, %c0_0, %c0_1] : memref<7x8x128xf32, #tpu.memory_space<vmem>>, vector<1x8x128xf32>
    %1 = vector.shape_cast %0 : vector<1x8x128xf32> to vector<8x128xf32>
    %c1 = arith.constant 1 : index
    %c0_2 = arith.constant 0 : index
    %c0_3 = arith.constant 0 : index
    %2 = vector.load %arg1[%c1, %c0_2, %c0_3] : memref<7x8x128xf32, #tpu.memory_space<vmem>>, vector<1x8x128xf32>
    %3 = vector.shape_cast %2 : vector<1x8x128xf32> to vector<8x128xf32>
    %c2 = arith.constant 2 : index
    %c0_4 = arith.constant 0 : index
    %c0_5 = arith.constant 0 : index
    %4 = vector.load %arg1[%c2, %c0_4, %c0_5] : memref<7x8x128xf32, #tpu.memory_space<vmem>>, vector<1x8x128xf32>
    %5 = vector.shape_cast %4 : vector<1x8x128xf32> to vector<8x128xf32>
    %c3 = arith.constant 3 : index
    %c0_6 = arith.constant 0 : index
    %c0_7 = arith.constant 0 : index
    %6 = vector.load %arg1[%c3, %c0_6, %c0_7] : memref<7x8x128xf32, #tpu.memory_space<vmem>>, vector<1x8x128xf32>
    %7 = vector.shape_cast %6 : vector<1x8x128xf32> to vector<8x128xf32>
    %c4 = arith.constant 4 : index
    %c0_8 = arith.constant 0 : index
    %c0_9 = arith.constant 0 : index
    %8 = vector.load %arg1[%c4, %c0_8, %c0_9] : memref<7x8x128xf32, #tpu.memory_space<vmem>>, vector<1x8x128xf32>
    %9 = vector.shape_cast %8 : vector<1x8x128xf32> to vector<8x128xf32>
    %c5 = arith.constant 5 : index
    %c0_10 = arith.constant 0 : index
    %c0_11 = arith.constant 0 : index
    %10 = vector.load %arg1[%c5, %c0_10, %c0_11] : memref<7x8x128xf32, #tpu.memory_space<vmem>>, vector<1x8x128xf32>
    %11 = vector.shape_cast %10 : vector<1x8x128xf32> to vector<8x128xf32>
    %c6 = arith.constant 6 : index
    %c0_12 = arith.constant 0 : index
    %c0_13 = arith.constant 0 : index
    %12 = vector.load %arg1[%c6, %c0_12, %c0_13] : memref<7x8x128xf32, #tpu.memory_space<vmem>>, vector<1x8x128xf32>
    %13 = vector.shape_cast %12 : vector<1x8x128xf32> to vector<8x128xf32>
    %c0_14 = arith.constant 0 : index
    %c0_15 = arith.constant 0 : index
    %c0_16 = arith.constant 0 : index
    %14 = vector.load %arg2[%c0_14, %c0_15, %c0_16] : memref<7x8x128xf32, #tpu.memory_space<vmem>>, vector<1x8x128xf32>
    %15 = vector.shape_cast %14 : vector<1x8x128xf32> to vector<8x128xf32>
    %c1_17 = arith.constant 1 : index
    %c0_18 = arith.constant 0 : index
    %c0_19 = arith.constant 0 : index
    %16 = vector.load %arg2[%c1_17, %c0_18, %c0_19] : memref<7x8x128xf32, #tpu.memory_space<vmem>>, vector<1x8x128xf32>
    %17 = vector.shape_cast %16 : vector<1x8x128xf32> to vector<8x128xf32>
    %c2_20 = arith.constant 2 : index
    %c0_21 = arith.constant 0 : index
    %c0_22 = arith.constant 0 : index
    %18 = vector.load %arg2[%c2_20, %c0_21, %c0_22] : memref<7x8x128xf32, #tpu.memory_space<vmem>>, vector<1x8x128xf32>
    %19 = vector.shape_cast %18 : vector<1x8x128xf32> to vector<8x128xf32>
    %c3_23 = arith.constant 3 : index
    %c0_24 = arith.constant 0 : index
    %c0_25 = arith.constant 0 : index
    %20 = vector.load %arg2[%c3_23, %c0_24, %c0_25] : memref<7x8x128xf32, #tpu.memory_space<vmem>>, vector<1x8x128xf32>
    %21 = vector.shape_cast %20 : vector<1x8x128xf32> to vector<8x128xf32>
    %c4_26 = arith.constant 4 : index
    %c0_27 = arith.constant 0 : index
    %c0_28 = arith.constant 0 : index
    %22 = vector.load %arg2[%c4_26, %c0_27, %c0_28] : memref<7x8x128xf32, #tpu.memory_space<vmem>>, vector<1x8x128xf32>
    %23 = vector.shape_cast %22 : vector<1x8x128xf32> to vector<8x128xf32>
    %c5_29 = arith.constant 5 : index
    %c0_30 = arith.constant 0 : index
    %c0_31 = arith.constant 0 : index
    %24 = vector.load %arg2[%c5_29, %c0_30, %c0_31] : memref<7x8x128xf32, #tpu.memory_space<vmem>>, vector<1x8x128xf32>
    %25 = vector.shape_cast %24 : vector<1x8x128xf32> to vector<8x128xf32>
    %c6_32 = arith.constant 6 : index
    %c0_33 = arith.constant 0 : index
    %c0_34 = arith.constant 0 : index
    %26 = vector.load %arg2[%c6_32, %c0_33, %c0_34] : memref<7x8x128xf32, #tpu.memory_space<vmem>>, vector<1x8x128xf32>
    %27 = vector.shape_cast %26 : vector<1x8x128xf32> to vector<8x128xf32>
    %cst = arith.constant 1.000000e+00 : f32
    %28 = vector.broadcast %cst : f32 to vector<8x128xf32>
    %29 = arith.cmpf oeq, %19, %28 : vector<8x128xf32>
    %30 = arith.extui %29 : vector<8x128xi1> to vector<8x128xi32>
    %31 = arith.sitofp %30 : vector<8x128xi32> to vector<8x128xf32>
    %32 = arith.subf %7, %21 : vector<8x128xf32>
    %33 = arith.subf %9, %23 : vector<8x128xf32>
    %34 = arith.mulf %32, %32 : vector<8x128xf32>
    %35 = arith.mulf %33, %33 : vector<8x128xf32>
    %36 = arith.addf %34, %35 : vector<8x128xf32>
    %37 = arith.addf %11, %25 : vector<8x128xf32>
    %38 = arith.mulf %11, %25 : vector<8x128xf32>
    %39 = math.sqrt %38 : vector<8x128xf32>
    %cst_35 = arith.constant 2.000000e+00 : f32
    %40 = vector.broadcast %cst_35 : f32 to vector<8x128xf32>
    %41 = arith.mulf %40, %39 : vector<8x128xf32>
    %42 = arith.subf %37, %41 : vector<8x128xf32>
    %43 = arith.addf %13, %27 : vector<8x128xf32>
    %44 = arith.mulf %13, %27 : vector<8x128xf32>
    %45 = math.sqrt %44 : vector<8x128xf32>
    %cst_36 = arith.constant 2.000000e+00 : f32
    %46 = vector.broadcast %cst_36 : f32 to vector<8x128xf32>
    %47 = arith.mulf %46, %45 : vector<8x128xf32>
    %48 = arith.subf %43, %47 : vector<8x128xf32>
    %49 = arith.addf %42, %48 : vector<8x128xf32>
    %50 = arith.addf %36, %49 : vector<8x128xf32>
    %cst_37 = arith.constant 5.000000e+00 : f32
    %51 = vector.broadcast %cst_37 : f32 to vector<8x128xf32>
    %52 = arith.mulf %51, %50 : vector<8x128xf32>
    %c0_38 = arith.constant 0 : index
    %c0_39 = arith.constant 0 : index
    %53 = vector.load %arg3[%c0_38, %c0_39] : memref<8x128xf32, #tpu.memory_space<vmem>>, vector<8x128xf32>
    tpu.vector_store %arg3[%c0_38, %c0_39], %52 {strides = array<i32>} : memref<8x128xf32, #tpu.memory_space<vmem>>, vector<8x128xf32>,
    %54 = arith.subf %5, %19 : vector<8x128xf32>
    %55 = arith.mulf %54, %54 : vector<8x128xf32>
    %c0_40 = arith.constant 0 : index
    %c0_41 = arith.constant 0 : index
    %56 = vector.load %arg4[%c0_40, %c0_41] : memref<8x128xf32, #tpu.memory_space<vmem>>, vector<8x128xf32>
    tpu.vector_store %arg4[%c0_40, %c0_41], %55 {strides = array<i32>} : memref<8x128xf32, #tpu.memory_space<vmem>>, vector<8x128xf32>,
    %57 = arith.subf %1, %3 : vector<8x128xf32>
    %58 = math.absf %57 : vector<8x128xf32>
    %59 = arith.maximumf %1, %3 : vector<8x128xf32>
    %cst_42 = arith.constant 0.000000e+00 : f32
    %60 = vector.broadcast %cst_42 : f32 to vector<8x128xf32>
    %61 = arith.subf %60, %58 : vector<8x128xf32>
    %62 = math.exp %61 : vector<8x128xf32>
    %cst_43 = arith.constant 1.000000e+00 : f32
    %63 = vector.broadcast %cst_43 : f32 to vector<8x128xf32>
    %64 = arith.addf %63, %62 : vector<8x128xf32>
    %65 = math.log %64 : vector<8x128xf32>
    %66 = arith.addf %59, %65 : vector<8x128xf32>
    %67 = arith.subf %66, %1 : vector<8x128xf32>
    %68 = arith.mulf %15, %67 : vector<8x128xf32>
    %69 = arith.subf %66, %3 : vector<8x128xf32>
    %70 = arith.mulf %17, %69 : vector<8x128xf32>
    %71 = arith.addf %68, %70 : vector<8x128xf32>
    %72 = arith.mulf %31, %71 : vector<8x128xf32>
    %c0_44 = arith.constant 0 : index
    %c0_45 = arith.constant 0 : index
    %73 = vector.load %arg5[%c0_44, %c0_45] : memref<8x128xf32, #tpu.memory_space<vmem>>, vector<8x128xf32>
    tpu.vector_store %arg5[%c0_44, %c0_45], %72 {strides = array<i32>} : memref<8x128xf32, #tpu.memory_space<vmem>>, vector<8x128xf32>,
    %c0_46 = arith.constant 0 : index
    %c0_47 = arith.constant 0 : index
    %74 = vector.load %arg6[%c0_46, %c0_47] : memref<8x128xf32, #tpu.memory_space<vmem>>, vector<8x128xf32>
    tpu.vector_store %arg6[%c0_46, %c0_47], %31 {strides = array<i32>} : memref<8x128xf32, #tpu.memory_space<vmem>>, vector<8x128xf32>,
    return
  }
  func.func @transform_0(%arg0: i32) -> (i32, i32, i32) {
    %c0_i32 = arith.constant 0 : i32
    %c0_i32_0 = arith.constant 0 : i32
    %c0_i32_1 = arith.constant 0 : i32
    return %c0_i32, %arg0, %c0_i32_0 : i32, i32, i32
  }
  func.func @transform_1(%arg0: i32) -> (i32, i32, i32) {
    %c0_i32 = arith.constant 0 : i32
    %c0_i32_0 = arith.constant 0 : i32
    %c0_i32_1 = arith.constant 0 : i32
    return %c0_i32, %arg0, %c0_i32_0 : i32, i32, i32
  }
  func.func @transform_2(%arg0: i32) -> (i32, i32) {
    %c0_i32 = arith.constant 0 : i32
    %c0_i32_0 = arith.constant 0 : i32
    return %arg0, %c0_i32 : i32, i32
  }
  func.func @transform_3(%arg0: i32) -> (i32, i32) {
    %c0_i32 = arith.constant 0 : i32
    %c0_i32_0 = arith.constant 0 : i32
    return %arg0, %c0_i32 : i32, i32
  }
  func.func @transform_4(%arg0: i32) -> (i32, i32) {
    %c0_i32 = arith.constant 0 : i32
    %c0_i32_0 = arith.constant 0 : i32
    return %arg0, %c0_i32 : i32, i32
  }
  func.func @transform_5(%arg0: i32) -> (i32, i32) {
    %c0_i32 = arith.constant 0 : i32
    %c0_i32_0 = arith.constant 0 : i32
    return %arg0, %c0_i32 : i32, i32
  }
}

</mosaic_0001>

<bundles_post_ra>
// kernel: _yolo_loss_dense.1
= control target key start
LH: loop header
LB: loop body
LE: loop exit
PB: predicated region body
PF: predicated region fallthrough
CT: control target
= control target key end

     0   :  { %v134_v12 = vmov 0.0   ;;  %s229_s0 = inlined_call_operand.vmem [shape: f32[7,8,128], index: 0, kind: input, shape index: {}]   ;;  %s230_s1 = inlined_call_operand.vmem [shape: f32[7,8,128], index: 1, kind: input, shape index: {}]   ;;  %s231_s5 = inlined_call_operand.vmem [shape: f32[8,128], index: 5, kind: output, shape index: {3}]   ;;  %s232_s3 = inlined_call_operand.vmem [shape: f32[8,128], index: 3, kind: output, shape index: {1}]   ;;  %s233_s2 = inlined_call_operand.vmem [shape: f32[8,128], index: 2, kind: output, shape index: {0}]   ;;  %s234_s4 = inlined_call_operand.vmem [shape: f32[8,128], index: 4, kind: output, shape index: {2}]  }
   0x1   :  { %v116_v0 = vld [vmem:[%s229_s0 + $0x28] sm:$0xff]  ;;  %v117_v1 = vld [vmem:[%s229_s0 + $0x30] sm:$0xff]  ;;  %v186_v9 = vld [vmem:[%s229_s0] sm:$0xff] }
   0x2   :  { %v122_v2 = vld [vmem:[%s230_s1 + $0x28] sm:$0xff]  ;;  %v123_v3 = vld [vmem:[%s230_s1 + $0x30] sm:$0xff]  ;;  %v114_v16 = vld [vmem:[%s229_s0 + $0x18] sm:$0xff] }
   0x3   :  { %v113_v4 = vld [vmem:[%s229_s0 + $0x10] sm:$0xff]  ;;  %v50_v5 = vmul.f32 %v122_v2, %v116_v0  ;;  %v61_v6 = vmul.f32 %v123_v3, %v117_v1  ;;  %v191_v10 = vld [vmem:[%s229_s0 + $0x8] sm:$0xff]  ;;  %v120_v17 = vld [vmem:[%s230_s1 + $0x18] sm:$0xff]  ;;  %v49_v30 = vadd.f32 %v122_v2, %v116_v0  ;;  %v60_v32 = vadd.f32 %v123_v3, %v117_v1 }
   0x4   :  { %v119_v7 = vld [vmem:[%s230_s1 + $0x10] sm:$0xff]  ;;  %v78_v14 = vsub.f32 %v186_v9, %v191_v10  ;;  %v115_v19 = vld [vmem:[%s229_s0 + $0x20] sm:$0xff]  ;;  %v44_v22 = vsub.f32 %v114_v16, %v120_v17  ;;  %v80_v48 = vmax.f32 %v186_v9, %v191_v10  ;;  %v118_v53 = vld [vmem:[%s230_s1 + $0x8] sm:$0xff] }
   0x5   :  { %v75_v8 = vsub.f32 %v113_v4, %v119_v7  ;;  %vm41_vm0 = vcmp.eq.f32.partialorder %v119_v7, 1.0  ;;  %126 = vrsqrt.f32 %v50_v5  ;;  %v121_v20 = vld [vmem:[%s230_s1 + $0x20] sm:$0xff]  ;;  %vm53_vm1 = vcmp.eq.f32.partialorder %v50_v5, inf }
   0x6   :  { %128 = vrsqrt.f32 %v61_v6  ;;  %v124_v13 = vsel %vm41_vm0, 1.0, %v134_v12  ;;  %v79_v15 = vand.u32 2147483647, %v78_v14  ;;  %v45_v24 = vsub.f32 %v115_v19, %v121_v20  ;;  %v28_v52 = vld [vmem:[%s230_s1] sm:$0xff] }
   0x7   :  { %v76_v11 = vmul.f32 %v75_v8, %v75_v8  ;;  %95 = vst [vmem:[%s231_s5] sm:$0xff] %v124_v13  ;;  %v56_v25 = vand.u32 2147483648, %v50_v5  ;;  %vm55_vm2 = vcmp.eq.f32.partialorder %v50_v5, 0.0  ;;  %vm64_vm3 = vcmp.eq.f32.partialorder %v61_v6, inf }
   0x8   :  { %v81_v18 = vsub.f32 0.0, %v79_v15  ;;  %v67_v28 = vand.u32 2147483648, %v61_v6  ;;  %vm66_vm4 = vcmp.eq.f32.partialorder %v61_v6, 0.0  ;;  %v46_v33 = vmul.f32 %v44_v22, %v44_v22 }
   0x9   :  { %77 = vst [vmem:[%s232_s3] sm:$0xff] %v76_v11  ;;  %v47_v34 = vmul.f32 %v45_v24, %v45_v24 }
   0xa   :  { %v82_v21 = vmul.f32 1.442695, %v81_v18 }
   0xb   :  { %v48_v41 = vadd.f32 %v47_v34, %v46_v33 }
   0xc   :  { %130 = vpow2.f32 %v82_v21 }
   0xf   :  { %v127_v23 = vpop.eup %126 }
  0x10   :  { %v129_v26 = vpop.eup %128  ;;  %v52_v27 = vmul.f32 %v127_v23, %v50_v5 }
  0x11   :  { %v63_v29 = vmul.f32 %v129_v26, %v61_v6 }
  0x12   :  { %v54_v31 = vsel %vm53_vm1, %v50_v5, %v52_v27 }
  0x13   :  { %v57_v35 = vsel %vm55_vm2, %v56_v25, %v54_v31  ;;  %v65_v36 = vsel %vm64_vm3, %v61_v6, %v63_v29 }
  0x14   :  { %v58_v37 = vmul.f32 2.0, %v57_v35  ;;  %v68_v38 = vsel %vm66_vm4, %v67_v28, %v65_v36 }
  0x15   :  { %v69_v39 = vmul.f32 2.0, %v68_v38 }
  0x16   :  { %v59_v40 = vsub.f32 %v49_v30, %v58_v37  ;;  %v131_v43 = vpop.eup %130 }
  0x17   :  { %v70_v42 = vsub.f32 %v60_v32, %v69_v39  ;;  %v84_v45 = vadd.f32 1.0, %v131_v43 }
  0x19   :  { %v71_v44 = vadd.f32 %v70_v42, %v59_v40  ;;  %132 = vlog2.f32 %v84_v45 }
  0x1b   :  { %v72_v46 = vadd.f32 %v71_v44, %v48_v41 }
  0x1d   :  { %v73_v47 = vmul.f32 5.0, %v72_v46 }
  0x1f   :  { %74 = vst [vmem:[%s233_s2] sm:$0xff] %v73_v47 }
  0x23   :  { %v133_v49 = vpop.eup %132 }
  0x24   :  { %v86_v50 = vmul.f32 0.6931472, %v133_v49 }
  0x26   :  { %v87_v51 = vadd.f32 %v86_v50, %v80_v48 }
  0x28   :  { %v88_v54 = vsub.f32 %v87_v51, %v186_v9  ;;  %v90_v55 = vsub.f32 %v87_v51, %v191_v10 }
  0x2a   :  { %v89_v56 = vmul.f32 %v88_v54, %v28_v52  ;;  %v91_v57 = vmul.f32 %v118_v53, %v90_v55 }
  0x2c   :  { %v92_v58 = vadd.f32 %v91_v57, %v89_v56 }
  0x2e   :  { %v93_v59 = vmul.f32 %v124_v13, %v92_v58 }
  0x30   :  { %94 = vst [vmem:[%s234_s4] sm:$0xff] %v93_v59 }

</bundles_post_ra>
